<compile_context>
chip_gen: v6e
topology: v6e:2x2x1
jax: 0.10.0
libtpu: 0.0.40
codegen_flags: <defaults>
</compile_context>

<pallas_src>
import jax
import jax.numpy as jnp
from jax.experimental import pallas as pl
from jax.experimental.pallas import tpu as pltpu

_LN2 = 0.6931471805599453
_LANE = 128                 # lane-dense last dim (vreg lane width)
_MAX_BLOCK_ROWS = 2048      # (2048, 128) f32 tile = 1 MiB/stream; safe on v5e/v6e/v7x
_FAST_PATH_ELEMS = 1 << 17  # below this, fused XLA beats a Pallas launch


def deny_kernel(w_ref, x0_ref, x1_ref, y0_ref, y1_ref):
    # w_ref: SMEM (3,) f32 = (w0n, w1n, w0n + ln2)   with w = log_softmax pair
    # x*/y* refs: VMEM (block_rows, 128) tiles of the flattened arrays.
    w0n = w_ref[0]
    w1n = w_ref[1]
    w0n_ln2 = w_ref[2]

    # Compute in f32 regardless of input dtype; cast only at the store.
    x0 = x0_ref[...].astype(jnp.float32)
    x1 = x1_ref[...].astype(jnp.float32)

    # y0 = logaddexp(w0n + x0, w1n + x1), numerically stable.
    a = x0 + w0n
    b = x1 + w1n
    m = jnp.maximum(a, b)
    d = jnp.abs(a - b)
    # a == b == +/-inf gives d = NaN; logaddexp of equal infinities is that
    # infinity, which m + log1p(1) already produces, so zero the NaN delta.
    d = jnp.where(jnp.isnan(d), jnp.float32(0.0), d)
    y0 = m + jnp.log1p(jnp.exp(-d))
    y0_ref[...] = y0.astype(y0_ref.dtype)

    # y1 = logaddexp(w0n + x1, w0n + x1) == (w0n + x1) + ln(2)   (exact)
    y1_ref[...] = (x1 + w0n_ln2).astype(y1_ref.dtype)


def deny_layer(w, x0, x1, *, force_pallas=False):
    B, Y = x0.shape
    assert x1.shape == (B, Y)
    assert w.shape == (2, Y)
    # DenyLayer.y_dim == 1 and forward asserts X == Y, so Y is always 1.
    assert Y == 1, "DenyLayer is defined for y_dim == 1"

    out_dtype = x0.dtype

    # --- hoisted (2, Y) pair log-softmax (plain JAX, f32) ------------------
    wf = w.astype(jnp.float32)
    w_sum = jnp.logaddexp(wf[0], wf[1])          # (Y,)
    w0n = wf[0] - w_sum                          # (Y,) == (1,)
    w1n = wf[1] - w_sum

    n = B * Y

    # --- small-input fast path: fused XLA elementwise, no kernel launch ----
    if n < _FAST_PATH_ELEMS and not force_pallas:
        a = x0.astype(jnp.float32) + w0n.reshape(1, Y)
        b = x1.astype(jnp.float32) + w1n.reshape(1, Y)
        y0 = jnp.logaddexp(a, b).astype(out_dtype)
        y1 = (x1.astype(jnp.float32) + (w0n + _LN2).reshape(1, Y)).astype(out_dtype)
        return y0, y1

    # --- Pallas path -------------------------------------------------------
    w_scalars = jnp.concatenate([w0n, w1n, w0n + jnp.float32(_LN2)])  # (3,) f32

    # Lane-dense slab: flatten (B, 1) -> (rows, 128).  Pad only up to a
    # multiple of 128 (a pure-reshape bitcast when n % 128 == 0).
    rows = pl.cdiv(n, _LANE)
    n_padded = rows * _LANE

    def to_slab(x):
        flat = x.reshape(n)
        if n_padded != n:
            flat = jnp.pad(flat, (0, n_padded - n))
        return flat.reshape(rows, _LANE)

    x0_s = to_slab(x0)
    x1_s = to_slab(x1)

    # Tile rows; cap block so the grid has >= 2 blocks when possible (v7x has
    # two TensorCores sharing the "parallel" axis).  Last block may be partial
    # (Pallas masks the out-of-bounds writes).
    block_rows = max(8, min(_MAX_BLOCK_ROWS, 8 * pl.cdiv(pl.cdiv(rows, 2), 8)))
    grid = (pl.cdiv(rows, block_rows),)

    tile_spec = pl.BlockSpec((block_rows, _LANE), lambda i: (i, 0))
    in_isz = jnp.dtype(x0.dtype).itemsize
    in1_isz = jnp.dtype(x1.dtype).itemsize
    out_isz = jnp.dtype(out_dtype).itemsize
    cost = pl.CostEstimate(
        flops=8 * n_padded,
        transcendentals=2 * n_padded,          # exp + log1p per element (y0)
        bytes_accessed=n_padded * (in_isz + in1_isz + 2 * out_isz) + 12,
    )

    y0_s, y1_s = pl.pallas_call(
        deny_kernel,
        out_shape=(
            jax.ShapeDtypeStruct((rows, _LANE), out_dtype),
            jax.ShapeDtypeStruct((rows, _LANE), out_dtype),
        ),
        grid=grid,
        in_specs=[
            pl.BlockSpec(memory_space=pltpu.MemorySpace.SMEM),  # (3,) scalars
            tile_spec,                                          # x0 slab
            tile_spec,                                          # x1 slab
        ],
        out_specs=(tile_spec, tile_spec),
        compiler_params=pltpu.CompilerParams(
            dimension_semantics=("parallel",),   # shard row-blocks across TCs
            vmem_limit_bytes=32 * 1024 * 1024,
        ),
        cost_estimate=cost,
    )(w_scalars, x0_s, x1_s)

    def from_slab(y):
        if n_padded == n:
            return y.reshape(B, Y)               # bitcast-only reshape
        return y.reshape(n_padded)[:n].reshape(B, Y)

    return from_slab(y0_s), from_slab(y1_s)


def _reference(w, x0, x1):
    # plain-JAX reference (mirrors the PyTorch forward exactly)
    w_sum = jnp.logaddexp(w[0:1], w[1:2])
    w0n = (w[0:1] - w_sum).reshape(1, -1)
    w1n = (w[1:2] - w_sum).reshape(1, -1)
    y0 = jnp.logaddexp(w0n + x0, w1n + x1)
    y1 = jnp.logaddexp(w0n + x1, w0n + x1)
    return y0, y1


if __name__ == "__main__":
    key = jax.random.PRNGKey(0)
    k_w, k_x0, k_x1 = jax.random.split(key, 3)

    Y = 1  # DenyLayer.y_dim == 1; forward asserts X == Y
    # deterministic "parameter" init, mirroring torch.randn((2, y_dim))
    w = jax.random.normal(k_w, (2, Y), dtype=jnp.float32)

    ok = True
    # (B, force_pallas): small batch -> fused fast path; larger batches force
    # the Pallas kernel (one lane-aligned, one with a padded/partial tail).
    for B, force in ((8, False), (8192, True), (777, True)):
        x0 = jax.random.normal(jax.random.fold_in(k_x0, B), (B, Y), dtype=jnp.float32)
        x1 = jax.random.normal(jax.random.fold_in(k_x1, B), (B, Y), dtype=jnp.float32)

        y0, y1 = deny_layer(w, x0, x1, force_pallas=force)
        jax.block_until_ready((y0, y1))

        y0_ref, y1_ref = _reference(w, x0, x1)
        ok &= y0.shape == (B, Y) and y1.shape == (B, Y)
        ok &= bool(jnp.allclose(y0, y0_ref, atol=1e-5))
        ok &= bool(jnp.allclose(y1, y1_ref, atol=1e-5))
        assert ok, f"mismatch at B={B}, force_pallas={force}"

    print("KERNEL_OK")
</pallas_src>

<mosaic_0001>
module attributes {stable_mosaic.version = 11 : i64} {
  func.func @deny_kernel(%arg0: i32, %arg1: memref<3xf32, #tpu.memory_space<smem>>, %arg2: memref<32x128xf32, #tpu.memory_space<vmem>>, %arg3: memref<32x128xf32, #tpu.memory_space<vmem>>, %arg4: memref<32x128xf32, #tpu.memory_space<vmem>>, %arg5: memref<32x128xf32, #tpu.memory_space<vmem>>) attributes {dimension_semantics = [#tpu.dimension_semantics<parallel>], iteration_bounds = array<i64: 2>, scalar_prefetch = 0 : i64, scratch_operands = 0 : i64, tpu.core_type = #tpu.core_type<tc>, window_params = [{transform_indices = @transform_0, window_bounds = array<i64: 3>}, {transform_indices = @transform_1, window_bounds = array<i64: 32, 128>}, {transform_indices = @transform_2, window_bounds = array<i64: 32, 128>}, {transform_indices = @transform_3, window_bounds = array<i64: 32, 128>}, {transform_indices = @transform_4, window_bounds = array<i64: 32, 128>}]} {
    %c0 = arith.constant 0 : index
    %0 = memref.load %arg1[%c0] : memref<3xf32, #tpu.memory_space<smem>>
    %c1 = arith.constant 1 : index
    %1 = memref.load %arg1[%c1] : memref<3xf32, #tpu.memory_space<smem>>
    %c2 = arith.constant 2 : index
    %2 = memref.load %arg1[%c2] : memref<3xf32, #tpu.memory_space<smem>>
    %c0_0 = arith.constant 0 : index
    %c0_1 = arith.constant 0 : index
    %3 = vector.load %arg2[%c0_0, %c0_1] : memref<32x128xf32, #tpu.memory_space<vmem>>, vector<32x128xf32>
    %c0_2 = arith.constant 0 : index
    %c0_3 = arith.constant 0 : index
    %4 = vector.load %arg3[%c0_2, %c0_3] : memref<32x128xf32, #tpu.memory_space<vmem>>, vector<32x128xf32>
    %5 = vector.broadcast %0 : f32 to vector<32x128xf32>
    %6 = arith.addf %3, %5 : vector<32x128xf32>
    %7 = vector.broadcast %1 : f32 to vector<32x128xf32>
    %8 = arith.addf %4, %7 : vector<32x128xf32>
    %9 = arith.maximumf %6, %8 : vector<32x128xf32>
    %10 = arith.subf %6, %8 : vector<32x128xf32>
    %11 = math.absf %10 : vector<32x128xf32>
    %12 = arith.cmpf one, %11, %11 : vector<32x128xf32>
    %cst = arith.constant 0.000000e+00 : f32
    %13 = vector.broadcast %cst : f32 to vector<32x128xf32>
    %14 = arith.select %12, %13, %11 : vector<32x128xi1>, vector<32x128xf32>
    %cst_4 = arith.constant 0.000000e+00 : f32
    %15 = vector.broadcast %cst_4 : f32 to vector<32x128xf32>
    %16 = arith.subf %15, %14 : vector<32x128xf32>
    %17 = math.exp %16 : vector<32x128xf32>
    %18 = math.log1p %17 : vector<32x128xf32>
    %19 = arith.addf %9, %18 : vector<32x128xf32>
    %c0_5 = arith.constant 0 : index
    %c0_6 = arith.constant 0 : index
    %20 = vector.load %arg4[%c0_5, %c0_6] : memref<32x128xf32, #tpu.memory_space<vmem>>, vector<32x128xf32>
    tpu.vector_store %arg4[%c0_5, %c0_6], %19 {strides = array<i32>} : memref<32x128xf32, #tpu.memory_space<vmem>>, vector<32x128xf32>,
    %21 = vector.broadcast %2 : f32 to vector<32x128xf32>
    %22 = arith.addf %4, %21 : vector<32x128xf32>
    %c0_7 = arith.constant 0 : index
    %c0_8 = arith.constant 0 : index
    %23 = vector.load %arg5[%c0_7, %c0_8] : memref<32x128xf32, #tpu.memory_space<vmem>>, vector<32x128xf32>
    tpu.vector_store %arg5[%c0_7, %c0_8], %22 {strides = array<i32>} : memref<32x128xf32, #tpu.memory_space<vmem>>, vector<32x128xf32>,
    return
  }
  func.func @transform_0(%arg0: i32) -> i32 {
    %c0_i32 = arith.constant 0 : i32
    %c0_i32_0 = arith.constant 0 : i32
    return %c0_i32 : i32
  }
  func.func @transform_1(%arg0: i32) -> (i32, i32) {
    %c0_i32 = arith.constant 0 : i32
    %c0_i32_0 = arith.constant 0 : i32
    return %arg0, %c0_i32 : i32, i32
  }
  func.func @transform_2(%arg0: i32) -> (i32, i32) {
    %c0_i32 = arith.constant 0 : i32
    %c0_i32_0 = arith.constant 0 : i32
    return %arg0, %c0_i32 : i32, i32
  }
  func.func @transform_3(%arg0: i32) -> (i32, i32) {
    %c0_i32 = arith.constant 0 : i32
    %c0_i32_0 = arith.constant 0 : i32
    return %arg0, %c0_i32 : i32, i32
  }
  func.func @transform_4(%arg0: i32) -> (i32, i32) {
    %c0_i32 = arith.constant 0 : i32
    %c0_i32_0 = arith.constant 0 : i32
    return %arg0, %c0_i32 : i32, i32
  }
}

</mosaic_0001>

<bundles_post_ra>
// kernel: tpu_custom_call.1
= control target key start
LH: loop header
LB: loop body
LE: loop exit
PB: predicated region body
PF: predicated region fallthrough
CT: control target
= control target key end

     0   :  { %s1205_s0 = inlined_call_operand.hbm [shape: f32[3], index: 0, kind: input, shape index: {}]   ;;  %s1206_s1 = inlined_call_operand.hbm [shape: f32[64,128], index: 1, kind: input, shape index: {}]   ;;  %s1207_s2 = inlined_call_operand.hbm [shape: f32[64,128], index: 2, kind: input, shape index: {}]   ;;  %s1208_s3 = inlined_call_operand.hbm [shape: f32[64,128], index: 3, kind: output, shape index: {0}]   ;;  %s1209_s4 = inlined_call_operand.hbm [shape: f32[64,128], index: 4, kind: output, shape index: {1}]  }
   0x1   :  { %1213 = sst [smem:[#allocation17_spill]] %s1205_s0 }
   0x2   :  { %10 = vsyncpa [#allocation5], 0 }
   0x3   :  { %11 = vsyncpa [#allocation3], 0 }
   0x4   :  { %13 = vsyncpa [#allocation3 + $0x1], 0 }
   0x5   :  { %14 = vsyncpa [#allocation8], 0 }
   0x6   :  { %16 = vsyncpa [#allocation8 + $0x1], 0 }
   0x7   :  { %17 = vsyncpa [#allocation4], 0 }
   0x8   :  { %19 = vsyncpa [#allocation4 + $0x1], 0 }
   0x9   :  { %20 = vsyncpa [#allocation11], 0 }
   0xa   :  { %22 = vsyncpa [#allocation11 + $0x1], 0  ;;  %s886_s15 = smov 0   ;;  %s888_s16 = smov 0  }
   0xb   :  { %s890_s17 = smov 0   ;;  %s892_s18 = smov 0  }
   0xc LB: > { %s907_s19 = sadd.s32 4294967295, %s850_s18   ;;  %s564_s20 = sadd.s32 4294967294, %s850_s18   ;;  %s850_s18 = sphi %s892_s18, %s1235_s18   ;;  %s846_s17 = sphi %s890_s17, %s1234_s17   ;;  %s842_s16 = sphi %s888_s16, %s1233_s16   ;;  %s838_s15 = sphi %s886_s15, %s1232_s15  }
   0xd   : > { %s911_s21 = sadd.s32 1, %s850_s18   ;;  %s56_s22 = sadd.s32 1, %s846_s17 }
   0xe   : > { %s53_s23 = ssub.s32 %s850_s18, %s911_s21  ;;  %p63_p0 = scmp.ne.s32.totalorder %s846_s17, %s842_s16 }
   0xf   : > { %p54_p1 = scmp.eq.s32.totalorder %s53_s23, 0  ;;  %p64_p2 = scmp.eq.s32.totalorder %s850_s18, 0 }
  0x10   : > { %p69_p3 = scmp.ne.s32.totalorder %s842_s16, %s838_s15  ;;  %p1210_p4 = scmp.eq.s32.totalorder %s907_s19, 0 }
  0x11   : > { %s923_s24 = scalar_select %p54_p1, %s846_s17, %s56_s22  }
  0x12   : > { %p925_p5 = por %p64_p2, %p63_p0  ;;  %p931_p6 = por %p1210_p4, %p69_p3 }
  0x13   : > { %p119_p7 = scmp.eq.s32.totalorder %s907_s19, 1  ;;  %p125_p8 = scmp.eq.s32.totalorder %s564_s20, 1 }
  0x14   : > { %s1215_s26 = scalar_select %p931_p6, 1, 0 }
  0x15   : > { %p565_p9 = scmp.ge.s32.totalorder %s850_s18, 1  ;;  %p158_p10 = scmp.lt.s32.totalorder %s850_s18, 3 }
  0x16   : > { %p938_p11 = por %p119_p7, %p63_p0  ;;  %p942_p12 = por %p125_p8, %p69_p3 }
  0x17   : > { %p946_p13 = pnand %p565_p9, %p158_p10  ;;  %p625_p4 = scmp.lt.s32.totalorder %s850_s18, 2 }
  0x18   : > { %s1216_s27 = scalar_select %p938_p11, 1, 0 }
  0x19   : > { %s1217_s28 = scalar_select %p942_p12, 1, 0 }
  0x1a   : > { %p606_p2 = pneg %p946_p13  ;;  %s955_s30 = sand.u32 1, %s846_s17  }
  0x1b   : > { %s590_s5 = sshll.u32 %s850_s18, 9  ;;  %p1219_p0 = scmp.eq.s32.totalorder %s907_s19, 0 }
  0x1c   : > { %p962_p7 = pnand %p625_p4, %p925_p5  ;;  %s568_s7 = sshll.u32 %s955_s30, 5 }
  0x1d   : > { %p607_p3 = pnand %p606_p2, %p1219_p0  ;;  %s852_s8 = smov [#allocation2]  }
  0x1e   : > { %s1221_s0 = sld [smem:[#allocation17_spill]]  ;;  %s975_s13 = scalar_lea.hbm %s1206_s1, %s590_s5 }
  0x1f   : > { %s184_s14 = scalar_lea.vmem [#allocation6], %s568_s7  ;;  %s181_s22 = scalar_lea.sflag [#allocation3], %s955_s30 }
  0x20   : > { %s191_s20 = sshll.u32 %s184_s14, 4  ;;  %s692_s23 = scalar_lea.hbm %s975_s13, 512  ;;  %s979_s20 = int_to_ptr.vmem [resolvable:$true] %s191_s20 }
  0x21   : > { %p693_p4 = scmp.ne.s32.totalorder %s975_s13, %s692_s23  ;;  %p694_p5 = pneg %p962_p7 }
  0x22   : > { %s697_s9 = scalar_lea.hbm %s1206_s1, 1024  ;;  %p698_p10 = scmp.lt.s32.totalorder %s975_s13, %s1206_s1 }
  0x23   : > { %p695_p8 = pnand %p694_p5, %p693_p4  ;;  %p699_p2 = scmp.lt.s32.totalorder %s697_s9, %s692_s23 }
  0x24   : > { %609 = dma.hbm_to_smem (!%p607_p3), %s1221_s0, 16, %s852_s8, [#allocation5]  }
  0x25   : > { %p696_p9 = pneg %p695_p8  ;;  %p700_p0 = por %p699_p2, %p698_p10 }
  0x27   : > { %p701_p3 = pnand %p700_p0, %p696_p9 }
  0x29   : > { %704 = shalt.err (!%p701_p3)
}
  0x2a   : > { %s705_s12 = scalar_lea.vmem %s979_s20, 512  ;;  %s853_s14 = smov [#allocation6]  }
  0x2b   : > { %p706_p1 = scmp.ne.s32.totalorder %s979_s20, %s705_s12  ;;  %s710_s25 = sshll.u32 %s853_s14, 4  ;;  %s711_s25 = int_to_ptr.vmem [resolvable:$false] %s710_s25 }
  0x2c   : > { %s712_s8 = scalar_lea.vmem %s711_s25, 1024  ;;  %p713_p12 = scmp.lt.s32.totalorder %s979_s20, %s711_s25 }
  0x2d   : > { %p708_p4 = pnand %p706_p1, %p694_p5  ;;  %p714_p11 = scmp.lt.s32.totalorder %s712_s8, %s705_s12 }
  0x2f   : > { %p709_p8 = pneg %p708_p4  ;;  %p715_p6 = por %p714_p11, %p713_p12 }
  0x31   : > { %p716_p10 = pnand %p715_p6, %p709_p8 }
  0x33   : > { %719 = shalt.err (!%p716_p10)
}
  0x34   : > { %s854_s23 = smov 128   ;;  %s855_s9 = smov 8  }
  0x35   : > { %613 = dma.hbm_to_vmem [thread:$0]  (!%p962_p7), %s975_s13, 512, %s979_s20, %s181_s22, %s854_s23, %s854_s23, %s855_s9  }
  0x36   : > { %s1016_s12 = scalar_lea.hbm %s1207_s2, %s590_s5  ;;  %s205_s14 = scalar_lea.vmem [#allocation7], %s568_s7 }
  0x37   : > { %s212_s25 = sshll.u32 %s205_s14, 4  ;;  %s202_s8 = scalar_lea.sflag [#allocation8], %s955_s30  ;;  %s1020_s25 = int_to_ptr.vmem [resolvable:$true] %s212_s25 }
  0x38   : > { %s720_s0 = scalar_lea.hbm %s1016_s12, 512  ;;  %s725_s5 = scalar_lea.hbm %s1207_s2, 1024 }
  0x39   : > { %p721_p6 = scmp.ne.s32.totalorder %s1016_s12, %s720_s0  ;;  %p726_p1 = scmp.lt.s32.totalorder %s1016_s12, %s1207_s2 }
  0x3a   : > { %p727_p9 = scmp.lt.s32.totalorder %s725_s5, %s720_s0 }
  0x3b   : > { %p723_p11 = pnand %p721_p6, %p694_p5 }
  0x3c   : > { %p728_p2 = por %p727_p9, %p726_p1 }
  0x3d   : > { %p724_p12 = pneg %p723_p11 }
  0x3f   : > { %p729_p0 = pnand %p728_p2, %p724_p12 }
  0x41   : > { %732 = shalt.err (!%p729_p0)
}
  0x42   : > { %s733_s30 = scalar_lea.vmem %s1020_s25, 512  ;;  %s856_s7 = smov [#allocation7]  }
  0x43   : > { %p734_p3 = scmp.ne.s32.totalorder %s1020_s25, %s733_s30  ;;  %s738_s11 = sshll.u32 %s856_s7, 4  ;;  %s739_s11 = int_to_ptr.vmem [resolvable:$false] %s738_s11 }
  0x44   : > { %s740_s14 = scalar_lea.vmem %s739_s11, 1024  ;;  %p741_p10 = scmp.lt.s32.totalorder %s1020_s25, %s739_s11 }
  0x45   : > { %p736_p4 = pnand %p734_p3, %p694_p5  ;;  %p742_p6 = scmp.lt.s32.totalorder %s740_s14, %s733_s30 }
  0x47   : > { %p737_p8 = pneg %p736_p4  ;;  %p743_p11 = por %p742_p6, %p741_p10 }
  0x49   : > { %p744_p1 = pnand %p743_p11, %p737_p8 }
  0x4b   : > { %747 = shalt.err (!%p744_p1)
}
  0x4c   : > { %616 = dma.hbm_to_vmem [thread:$0]  (!%p962_p7), %s1016_s12, 512, %s1020_s25, %s202_s8, %s854_s23, %s854_s23, %s855_s9  }
  0x4d   : > { %224 = sbr.rel (%p946_p13) target bundleno = 172 (0xac), region = 32  ;;  %p1222_p5 = scmp.eq.s32.totalorder (!%p946_p13), %s907_s19, 0 }
  0x52   : > { %817 = dma.done.wait (%p1222_p5), [#allocation5], 16   ;;  %p1223_p12 = pmov %p1222_p5 }
  0x53   : > { %s1055_s0 = sand.u32 1, %s842_s16   ;;  %p1224_p7 = scmp.ne.s32.totalorder %s1215_s26, 0 }
  0x54   : > { %819 = vsyncadd (%p1223_p12), [#allocation5], 4294967280  ;;  %s1058_s6 = sshll.u32 %s1055_s0, 5  ;;  %s231_s13 = scalar_lea.sflag [#allocation3], %s1055_s0 }
  0x55   : > { %s234_s23 = scalar_lea.vmem [#allocation6], %s1058_s6 }
  0x56   : > { %821 = dma.done.wait (%p1224_p7), %s231_s13, 512  }
  0x57   : > { %823 = vsyncadd (%p1224_p7), %s231_s13, 4294966784  ;;  %s240_s29 = scalar_lea.sflag [#allocation8], %s1055_s0  ;;  %s243_s9 = scalar_lea.vmem [#allocation7], %s1058_s6 }
  0x58   : > { %825 = dma.done.wait (%p1224_p7), %s240_s29, 512  }
  0x59   : > { %827 = vsyncadd (%p1224_p7), %s240_s29, 4294966784 }
  0x5a   : > { %248 = sfence }
  0x5b   : > { %s283_s12 = sld [smem:[#allocation2]]  ;;  %v286_v0 = vld [vmem:[%s234_s23] sm:$0xff]  ;;  %v287_v2 = vld [vmem:[%s234_s23 + $0x8] sm:$0xff]  ;;  %v288_v3 = vld [vmem:[%s234_s23 + $0x10] sm:$0xff]  ;;  %s278_s26 = scalar_lea.vmem [#allocation10], %s1058_s6 }
  0x5c   : > { %s580_s25 = sld [smem:[#allocation2 + $0x1]]  ;;  %v290_v1 = vld [vmem:[%s243_s9] sm:$0xff]  ;;  %v291_v4 = vld [vmem:[%s243_s9 + $0x8] sm:$0xff]  ;;  %v292_v5 = vld [vmem:[%s243_s9 + $0x10] sm:$0xff]  ;;  %s424_s20 = sshll.u32 %s278_s26, 4  ;;  %s1098_s20 = int_to_ptr.vmem [resolvable:$true] %s424_s20 }
  0x5d   : > { %s581_s8 = sld [smem:[#allocation2 + $0x2]]  ;;  %v289_v6 = vld [vmem:[%s234_s23 + $0x18] sm:$0xff]  ;;  %s592_s5 = sshll.u32 %s907_s19, 9 }
  0x5e   : > { %v293_v8 = vld [vmem:[%s243_s9 + $0x18] sm:$0xff]  ;;  %s1105_s30 = scalar_lea.hbm %s1209_s4, %s592_s5  ;;  %s395_s7 = scalar_lea.sflag [#allocation11], %s1055_s0 }
  0x5f   : > { %s748_s11 = scalar_lea.vmem %s1098_s20, 512  ;;  %p1225_p9 = scmp.ne.s32.totalorder %s1216_s27, 0 }
  0x60   : > { %p749_p13 = scmp.ne.s32.totalorder %s1098_s20, %s748_s11  ;;  %s857_s14 = smov [#allocation10]  }
  0x61   : > { %v294_v7 = vstv %s283_s12  ;;  %s752_s13 = sshll.u32 %s857_s14, 4  ;;  %s753_s13 = int_to_ptr.vmem [resolvable:$false] %s752_s13 }
  0x62   : > { %v1072_v9 = vadd.f32 %v294_v7, %v286_v0  ;;  %v299_v10 = vstv %s580_s25  ;;  %v1074_v11 = vadd.f32 %v294_v7, %v287_v2  ;;  %v1076_v12 = vadd.f32 %v294_v7, %v288_v3  ;;  %p750_p2 = pnand %p749_p13, %p1225_p9  ;;  %s754_s23 = scalar_lea.vmem %s753_s13, 1024 }
  0x63   : > { %v1078_v13 = vadd.f32 %v299_v10, %v290_v1  ;;  %v1080_v14 = vadd.f32 %v299_v10, %v291_v4  ;;  %v1082_v15 = vadd.f32 %v299_v10, %v292_v5  ;;  %v1084_v16 = vadd.f32 %v294_v7, %v289_v6  ;;  %p755_p3 = scmp.lt.s32.totalorder %s1098_s20, %s753_s13  ;;  %p756_p4 = scmp.lt.s32.totalorder %s754_s23, %s748_s11 }
  0x64   : > { %v1087_v17 = vadd.f32 %v299_v10, %v293_v8  ;;  %v380_v18 = vstv %s581_s8  ;;  %p751_p0 = pneg %p750_p2 }
  0x65   : > { %v308_v19 = vsub.f32 %v1072_v9, %v1078_v13  ;;  %v309_v20 = vsub.f32 %v1074_v11, %v1080_v14  ;;  %v310_v21 = vsub.f32 %v1076_v12, %v1082_v15  ;;  %v381_v25 = vadd.f32 %v380_v18, %v290_v1  ;;  %p757_p8 = por %p756_p4, %p755_p3 }
  0x66   : > { %v311_v22 = vsub.f32 %v1084_v16, %v1087_v17  ;;  %v382_v26 = vadd.f32 %v380_v18, %v291_v4  ;;  %v383_v29 = vadd.f32 %v380_v18, %v292_v5  ;;  %v384_v30 = vadd.f32 %v380_v18, %v293_v8 }
  0x67   : > { %v312_v23 = vand.u32 2147483647, %v308_v19  ;;  %v313_v24 = vand.u32 2147483647, %v309_v20  ;;  %v314_v27 = vand.u32 2147483647, %v310_v21  ;;  %385 = vst [vmem:[%s278_s26] sm:$0xff] %v381_v25  ;;  %p758_p10 = pnand %p757_p8, %p751_p0 }
  0x68   : > { %v315_v28 = vand.u32 2147483647, %v311_v22  ;;  %386 = vst [vmem:[%s278_s26 + $0x8] sm:$0xff] %v382_v26  ;;  %387 = vst [vmem:[%s278_s26 + $0x10] sm:$0xff] %v383_v29 }
  0x69   : > { %vm316_vm0 = vcmp.ne.f32.partialorder %v312_v23, %v312_v23  ;;  %vm317_vm1 = vcmp.ne.f32.partialorder %v313_v24, %v313_v24  ;;  %vm318_vm2 = vcmp.ne.f32.partialorder %v314_v27, %v314_v27  ;;  %388 = vst [vmem:[%s278_s26 + $0x18] sm:$0xff] %v384_v30 }
  0x6a   : > { %v320_v31 = vsel %vm316_vm0, 0.0, %v312_v23  ;;  %v321_v32 = vsel %vm317_vm1, 0.0, %v313_v24  ;;  %vm319_vm3 = vcmp.ne.f32.partialorder %v315_v28, %v315_v28  ;;  %v322_v35 = vsel %vm318_vm2, 0.0, %v314_v27 }
  0x6b   : > { %v324_v33 = vsub.f32 0.0, %v320_v31  ;;  %v325_v34 = vsub.f32 0.0, %v321_v32  ;;  %v323_v36 = vsel %vm319_vm3, 0.0, %v315_v28 }
  0x6c   : > { %761 = shalt.err (!%p758_p10)
}
  0x6d   : > { %s762_s29 = scalar_lea.hbm %s1105_s30, 512  ;;  %s766_s25 = scalar_lea.hbm %s1209_s4, 1024 }
  0x6e   : > { %p763_p6 = scmp.ne.s32.totalorder %s1105_s30, %s762_s29  ;;  %p767_p5 = scmp.lt.s32.totalorder %s1105_s30, %s1209_s4 }
  0x6f   : > { %p768_p12 = scmp.lt.s32.totalorder %s766_s25, %s762_s29 }
  0x70   : > { %p764_p11 = pnand %p763_p6, %p1225_p9 }
  0x71   : > { %p769_p7 = por %p768_p12, %p767_p5 }
  0x72   : > { %p765_p1 = pneg %p764_p11 }
  0x74   : > { %p770_p13 = pnand %p769_p7, %p765_p1 }
  0x76   : > { %773 = shalt.err (!%p770_p13)
}
  0x77   : > { %s858_s22 = smov 128   ;;  %s859_s10 = smov 8   ;;  %v326_v37 = vsub.f32 0.0, %v322_v35  ;;  %v327_v38 = vsub.f32 0.0, %v323_v36  ;;  %v328_v39 = vmul.f32 1.442695, %v324_v33  ;;  %v304_v0 = vmax.f32 %v1072_v9, %v1078_v13 }
  0x78   : > { %603 = dma.vmem_to_hbm [thread:$0]  (%p1225_p9), %s1098_s20, 512, %s1105_s30, %s395_s7, %s858_s22, %s858_s22, %s859_s10   ;;  %v330_v40 = vmul.f32 1.442695, %v325_v34  ;;  %v305_v6 = vmax.f32 %v1074_v11, %v1080_v14  ;;  %v306_v9 = vmax.f32 %v1076_v12, %v1082_v15  ;;  %v307_v14 = vmax.f32 %v1084_v16, %v1087_v17 }
  0x79   : > { %v332_v41 = vmul.f32 1.442695, %v326_v37  ;;  %v334_v42 = vmul.f32 1.442695, %v327_v38  ;;  %665 = vpow2.f32 %v328_v39  ;;  %s271_s20 = scalar_lea.vmem [#allocation9], %s1058_s6  ;;  %s1161_s11 = scalar_lea.hbm %s1208_s3, %s592_s5 }
  0x7a   : > { %667 = vpow2.f32 %v330_v40  ;;  %s408_s30 = sshll.u32 %s271_s20, 4  ;;  %s390_s14 = scalar_lea.sflag [#allocation4], %s1055_s0  ;;  %s1154_s30 = int_to_ptr.vmem [resolvable:$true] %s408_s30 }
  0x7b   : > { %669 = vpow2.f32 %v332_v41  ;;  %s774_s13 = scalar_lea.vmem %s1154_s30, 512  ;;  %s860_s23 = smov [#allocation9]  }
  0x7c   : > { %671 = vpow2.f32 %v334_v42  ;;  %p775_p2 = scmp.ne.s32.totalorder %s1154_s30, %s774_s13  ;;  %s778_s29 = sshll.u32 %s860_s23, 4  ;;  %s779_s29 = int_to_ptr.vmem [resolvable:$false] %s778_s29 }
  0x7d   : > { %s780_s9 = scalar_lea.vmem %s779_s29, 1024  ;;  %p781_p4 = scmp.lt.s32.totalorder %s1154_s30, %s779_s29 }
  0x7e   : > { %p776_p0 = pnand %p775_p2, %p1225_p9  ;;  %p782_p8 = scmp.lt.s32.totalorder %s780_s9, %s774_s13 }
  0x80   : > { %p777_p3 = pneg %p776_p0  ;;  %p783_p10 = por %p782_p8, %p781_p4 }
  0x82   : > { %p784_p6 = pnand %p783_p10, %p777_p3 }
  0x86   : > { %v666_v43 = vpop.eup %665 }
  0x87   : > { %v668_v44 = vpop.eup %667  ;;  %v336_v45 = vadd.f32 1.0, %v666_v43  ;;  %v339_v51 = vmul.f32 -0.5, %v666_v43  ;;  %v342_v56 = vand.u32 2147483647, %v666_v43 }
  0x88   : > { %v670_v46 = vpop.eup %669  ;;  %v345_v47 = vadd.f32 1.0, %v668_v44  ;;  %v348_v52 = vmul.f32 -0.5, %v668_v44  ;;  %v351_v58 = vand.u32 2147483647, %v668_v44 }
  0x89   : > { %v672_v48 = vpop.eup %671  ;;  %673 = vlog2.f32 %v336_v45  ;;  %v354_v49 = vadd.f32 1.0, %v670_v46  ;;  %v357_v53 = vmul.f32 -0.5, %v670_v46  ;;  %v340_v54 = vadd.f32 1.0, %v339_v51 }
  0x8a   : > { %675 = vlog2.f32 %v345_v47  ;;  %v363_v50 = vadd.f32 1.0, %v672_v48  ;;  %v366_v55 = vmul.f32 -0.5, %v672_v48  ;;  %v349_v57 = vadd.f32 1.0, %v348_v52 }
  0x8b   : > { %677 = vlog2.f32 %v354_v49  ;;  %v358_v59 = vadd.f32 1.0, %v357_v53  ;;  %v360_v60 = vand.u32 2147483647, %v670_v46  ;;  %v341_v61 = vmul.f32 %v666_v43, %v340_v54 }
  0x8c   : > { %679 = vlog2.f32 %v363_v50  ;;  %v367_v62 = vadd.f32 1.0, %v366_v55  ;;  %vm1135_vm4 = vcmp.lt.f32.partialorder %v342_v56, 0.0004427343  ;;  %v350_v2 = vmul.f32 %v668_v44, %v349_v57 }
  0x8d   : > { %v369_v3 = vand.u32 2147483647, %v672_v48  ;;  %vm1141_vm5 = vcmp.lt.f32.partialorder %v351_v58, 0.0004427343  ;;  %v359_v8 = vmul.f32 %v670_v46, %v358_v59  ;;  %vm361_vm6 = vcmp.lt.f32.partialorder %v360_v60, 0.0004427343 }
  0x8e   : > { %v368_v20 = vmul.f32 %v672_v48, %v367_v62 }
  0x8f   : > { %vm370_vm7 = vcmp.lt.f32.partialorder %v369_v3, 0.0004427343 }
  0x96   : > { %v674_v63 = vpop.eup %673 }
  0x97   : > { %v676_v4 = vpop.eup %675  ;;  %v338_v5 = vmul.f32 0.6931472, %v674_v63 }
  0x98   : > { %v678_v10 = vpop.eup %677  ;;  %v347_v18 = vmul.f32 0.6931472, %v676_v4 }
  0x99   : > { %v344_v13 = vsel %vm1135_vm4, %v341_v61, %v338_v5  ;;  %v356_v19 = vmul.f32 0.6931472, %v678_v10  ;;  %v680_v21 = vpop.eup %679 }
  0x9a   : > { %v372_v22 = vadd.f32 %v344_v13, %v304_v0  ;;  %v353_v11 = vsel %vm1141_vm5, %v350_v2, %v347_v18  ;;  %v365_v23 = vmul.f32 0.6931472, %v680_v21 }
  0x9b   : > { %v373_v12 = vadd.f32 %v353_v11, %v305_v6  ;;  %v362_v15 = vsel %vm361_vm6, %v359_v8, %v356_v19 }
  0x9c   : > { %376 = vst [vmem:[%s271_s20] sm:$0xff] %v372_v22  ;;  %v374_v24 = vadd.f32 %v362_v15, %v306_v9  ;;  %v371_v25 = vsel %vm370_vm7, %v368_v20, %v365_v23 }
  0x9d   : > { %377 = vst [vmem:[%s271_s20 + $0x8] sm:$0xff] %v373_v12  ;;  %v375_v26 = vadd.f32 %v371_v25, %v307_v14 }
  0x9e   : > { %378 = vst [vmem:[%s271_s20 + $0x10] sm:$0xff] %v374_v24 }
  0x9f   : > { %379 = vst [vmem:[%s271_s20 + $0x18] sm:$0xff] %v375_v26 }
  0xa0   : > { %787 = shalt.err (!%p784_p6)
}
  0xa1   : > { %s788_s19 = scalar_lea.hbm %s1161_s11, 512  ;;  %s792_s12 = scalar_lea.hbm %s1208_s3, 1024 }
  0xa2   : > { %p789_p11 = scmp.ne.s32.totalorder %s1161_s11, %s788_s19  ;;  %p793_p12 = scmp.lt.s32.totalorder %s1161_s11, %s1208_s3 }
  0xa3   : > { %p794_p7 = scmp.lt.s32.totalorder %s792_s12, %s788_s19 }
  0xa4   : > { %p790_p1 = pnand %p789_p11, %p1225_p9 }
  0xa5   : > { %p795_p13 = por %p794_p7, %p793_p12 }
  0xa6   : > { %p791_p5 = pneg %p790_p1 }
  0xa8   : > { %p796_p2 = pnand %p795_p13, %p791_p5 }
  0xaa   : > { %799 = shalt.err (!%p796_p2)
}
  0xab   : > { %602 = dma.vmem_to_hbm [thread:$0]  (%p1225_p9), %s1154_s30, 512, %s1161_s11, %s390_s14, %s858_s22, %s858_s22, %s859_s10  }
  0xac PF: > { %s439_s26 = sand.u32 1, %s838_s15   ;;  %p1230_p0 = scmp.ne.s32.totalorder %s1217_s28, 0 }
  0xad   : > { %p1231_p3 = scmp.ge.s32.totalorder %s850_s18, 2  ;;  %s440_s20 = scalar_lea.sflag [#allocation4], %s439_s26 }
  0xaf   : > { %p618_p4 = pnand %p1231_p3, %p1230_p0 }
  0xb1   : > { %p619_p8 = pneg %p618_p4 }
  0xb3   : > { %829 = dma.done.wait (%p619_p8), %s440_s20, 512  }
  0xb4   : > { %831 = vsyncadd (%p619_p8), %s440_s20, 4294966784  ;;  %s449_s6 = scalar_lea.sflag [#allocation11], %s439_s26 }
  0xb5   : > { %833 = dma.done.wait (%p619_p8), %s449_s6, 512  }
  0xb6   : > { %835 = vsyncadd (%p619_p8), %s449_s6, 4294966784  ;;  %p25_p9 = scmp.ge.s32.totalorder %s911_s21, 4   ;;  %s1232_s15 = smov %s842_s16 }
  0xb7   : > { %s1233_s16 = smov %s846_s17  ;;  %s1234_s17 = smov %s923_s24 }
  0xb8   : > { %s1235_s18 = smov %s911_s21  ;;  %27 = sbr.rel (!%p25_p9) target bundleno = 12 (0xc), region = 112 }
  0xbd   :  { %454 = vsyncpa [#allocation3], 1 }
  0xbe   :  { %456 = vsyncpa [#allocation3 + $0x1], 1 }
  0xbf   :  { %457 = vsyncpa [#allocation8], 1 }
  0xc0   :  { %459 = vsyncpa [#allocation8 + $0x1], 1 }
  0xc1   :  { %460 = vsyncpa [#allocation4], 1 }
  0xc2   :  { %462 = vsyncpa [#allocation4 + $0x1], 1 }
  0xc3   :  { %463 = vsyncpa [#allocation11], 1 }
  0xc4   :  { %465 = vsyncpa [#allocation11 + $0x1], 1 }
  0xc5   :  { %466 = vsyncpa [#allocation5], 1 }
  0xc6   :  { %468 = vsyncpa [#allocation5 + $0x1], 1 }

</bundles_post_ra>
